<compile_context>
chip_gen: v7x
topology: tpu7x:2x2x1
jax: 0.10.0
libtpu: 0.0.40
codegen_flags: <defaults>
</compile_context>

<pallas_src>
import functools
import math

import jax
import jax.numpy as jnp
from jax import lax
from jax.experimental import pallas as pl
from jax.experimental.pallas import tpu as pltpu


def _round_up(n: int, m: int) -> int:
    return ((n + m - 1) // m) * m


def _default_matmul_dtype():
    """bf16 operands on bf16-native MXUs (v6e / v7x); f32 elsewhere."""
    try:
        kind = jax.devices()[0].device_kind.lower()
    except Exception:
        return jnp.float32
    if ("v6" in kind) or ("v7" in kind) or ("7x" in kind) or ("trillium" in kind):
        return jnp.bfloat16
    return jnp.float32


def actor_kernel(x_ref, w1_ref, b1_ref, w2_ref, b2_ref, w3_ref, b3_ref,
                 o_ref, *, abs_scale: float, negative_slope: float,
                 num_actions: int, matmul_dtype):
    """One batch tile: Linear -> LeakyReLU -> Linear -> LeakyReLU -> Linear
       -> Head (y * tanh(||y||)/||y||) -> Scale -> abs."""
    x = x_ref[...].astype(matmul_dtype)

    # Linear 1 + LeakyReLU  (maximum(h, a*h) == LeakyReLU for 0 < a < 1)
    h = jnp.dot(x, w1_ref[...].astype(matmul_dtype),
                preferred_element_type=jnp.float32) + b1_ref[...]
    h = jnp.maximum(h, negative_slope * h)

    # Linear 2 + LeakyReLU
    h = jnp.dot(h.astype(matmul_dtype), w2_ref[...].astype(matmul_dtype),
                preferred_element_type=jnp.float32) + b2_ref[...]
    h = jnp.maximum(h, negative_slope * h)

    # Linear 3 into the 128 zero-padded action lanes (VMEM/vreg only).
    y = jnp.dot(h.astype(matmul_dtype), w3_ref[...].astype(matmul_dtype),
                preferred_element_type=jnp.float32) + b3_ref[...]

    # Head: y * tanh(||y||)/||y||.  Padded lanes are exactly zero, so the sum
    # over all lanes equals the sum over the real `num_actions` lanes.
    # rsqrt/tanh go to the EUP slot; the epsilon guards the 0/0 hazard and
    # keeps garbage rows from a ragged last tile finite (their writes are
    # masked away anyway).
    sumsq = jnp.sum(y * y, axis=-1, keepdims=True)
    inv_norm = lax.rsqrt(jnp.maximum(sumsq, 1e-30))
    factor = jnp.tanh(sumsq * inv_norm) * inv_norm          # tanh(n)/n >= 0

    # Scale + abs folded (|y*f*s| == |y|*f*|s| since f >= 0).  Store only the
    # real action columns -> no zero padding ever reaches HBM.
    o_ref[...] = jnp.abs(y[:, :num_actions]) * (factor * abs_scale)


def actor_forward(x, params, *, scale: float = 1.0, negative_slope: float = 0.01,
                  block_b: int = 8192, matmul_dtype=None):
    w1, b1, w2, b2, w3, b3 = params
    B, F = x.shape
    D = w1.shape[0]
    A = w3.shape[0]

    if matmul_dtype is None:
        matmul_dtype = _default_matmul_dtype()

    # Glue: PyTorch [out, in] -> [in, out]; biases as 2-D rows (VMEM-resident).
    w1t = w1.T                      # (F, D)
    w2t = w2.T                      # (D, D)
    b1r = b1.reshape(1, -1)
    b2r = b2.reshape(1, -1)

    # Zero-pad only the VMEM-resident last-layer params to 128 lanes.  The
    # exactly-zero padded columns/bias lanes keep the head's L2 norm exact.
    # (Invariant: 0.0 stays 0.0 under the matmul_dtype cast.)
    A_pad = max(128, _round_up(A, 128))
    w3t = jnp.zeros((D, A_pad), x.dtype).at[:, :A].set(w3.T)
    b3r = jnp.zeros((1, A_pad), x.dtype).at[:, :A].set(b3)

    # Batch tile: multiple of 8 sublanes; capped at ~ceil(B/2) so the grid has
    # at least 2 steps whenever possible (dual-TensorCore sharding on v7x) and
    # at block_b for VMEM.
    TB = min(int(block_b), _round_up(pl.cdiv(B, 2), 8))
    TB = max(8, _round_up(TB, 8))
    grid = (pl.cdiv(B, TB),)

    # Scoped-VMEM budget from the lane-padded footprint: ~4 KiB per row covers
    # the double-buffered x/out blocks plus intermediates; clamp for v7x
    # (64 MiB physical).
    vmem_limit = int(max(32 << 20, min(TB * 4096 + (4 << 20), 64 << 20)))

    def resident(shape):
        # Same block every grid step -> stays resident in VMEM (no re-DMA).
        return pl.BlockSpec(shape, lambda i: (0,) * len(shape))

    kernel = functools.partial(
        actor_kernel,
        abs_scale=abs(float(scale)),
        negative_slope=float(negative_slope),
        num_actions=A,
        matmul_dtype=matmul_dtype,
    )

    params_bytes = sum(int(p.size) * p.dtype.itemsize
                       for p in (w1t, b1r, w2t, b2r, w3t, b3r))
    cost = pl.CostEstimate(
        flops=2 * B * (F * D + D * D + D * A_pad) + 12 * B * D,
        transcendentals=2 * B,                           # tanh + rsqrt per row
        bytes_accessed=B * F * x.dtype.itemsize + B * A * 4 + params_bytes,
    )

    return pl.pallas_call(
        kernel,
        out_shape=jax.ShapeDtypeStruct((B, A), jnp.float32),
        grid=grid,
        in_specs=[
            pl.BlockSpec((TB, F), lambda i: (i, 0)),     # pipelined batch tiles
            resident(w1t.shape), resident(b1r.shape),
            resident(w2t.shape), resident(b2r.shape),
            resident(w3t.shape), resident(b3r.shape),
        ],
        out_specs=pl.BlockSpec((TB, A), lambda i: (i, 0)),   # un-padded store
        compiler_params=pltpu.CompilerParams(
            dimension_semantics=("parallel",),           # shard batch across TCs
            vmem_limit_bytes=vmem_limit,
        ),
        cost_estimate=cost,
    )(x, w1t, b1r, w2t, b2r, w3t, b3r)


def init_actor_params(key, num_observations=8, num_actions=2, dim=32, depth=3):
    """Deterministic init mimicking PyTorch nn.Linear default
       (uniform +-1/sqrt(fan_in)); weight shapes in PyTorch [out, in] order."""
    params = []
    in_f = num_observations
    for i in range(depth):
        out_f = num_actions if i == depth - 1 else dim
        key, kw, kb = jax.random.split(key, 3)
        bound = 1.0 / math.sqrt(in_f)
        w = jax.random.uniform(kw, (out_f, in_f), jnp.float32, -bound, bound)
        b = jax.random.uniform(kb, (out_f,), jnp.float32, -bound, bound)
        params += [w, b]
        in_f = out_f
    return tuple(params)


def actor_reference(x, params, *, scale=1.0, negative_slope=0.01):
    """Pure-JAX reference matching the PyTorch module."""
    w1, b1, w2, b2, w3, b3 = params
    h = x @ w1.T + b1
    h = jnp.where(h > 0, h, negative_slope * h)
    h = h @ w2.T + b2
    h = jnp.where(h > 0, h, negative_slope * h)
    y = h @ w3.T + b3
    norm = jnp.sqrt(jnp.sum(y * y, axis=-1, keepdims=True))
    y = y * (jnp.tanh(norm) / norm)
    return jnp.abs(y * scale)


if __name__ == "__main__":
    key = jax.random.PRNGKey(0)
    k_params, k_obs = jax.random.split(key)

    num_observations, num_actions, dim, depth, scale = 8, 2, 32, 3, 1.0
    batch = 2

    params = init_actor_params(k_params, num_observations, num_actions, dim, depth)
    obs = jax.random.normal(k_obs, (batch, num_observations), jnp.float32)
    ref = actor_reference(obs, params, scale=scale)

    # f32 matmul path: bit-tight check against the pure-JAX reference.
    out_f32 = jax.block_until_ready(
        actor_forward(obs, params, scale=scale, matmul_dtype=jnp.float32))
    assert out_f32.shape == (batch, num_actions), out_f32.shape
    assert jnp.allclose(out_f32, ref, atol=1e-5, rtol=1e-5), (out_f32, ref)

    # Default path (bf16 operands on v6e/v7x, f32 elsewhere): looser tolerance.
    out_auto = jax.block_until_ready(actor_forward(obs, params, scale=scale))
    assert out_auto.shape == (batch, num_actions)
    assert jnp.allclose(out_auto, ref, atol=5e-2, rtol=5e-2), (out_auto, ref)

    # Larger, non-multiple batch: exercises the >=2-step grid and the masked
    # ragged last tile (no wrapper-side padding copy, no post-kernel slice).
    obs_big = jax.random.normal(jax.random.PRNGKey(1), (3000, num_observations),
                                jnp.float32)
    ref_big = actor_reference(obs_big, params, scale=scale)

    out_big = jax.block_until_ready(
        actor_forward(obs_big, params, scale=scale, matmul_dtype=jnp.float32))
    assert out_big.shape == (3000, num_actions)
    assert jnp.allclose(out_big, ref_big, atol=1e-5, rtol=1e-5)

    out_big_auto = jax.block_until_ready(actor_forward(obs_big, params, scale=scale))
    assert out_big_auto.shape == (3000, num_actions)
    assert jnp.allclose(out_big_auto, ref_big, atol=5e-2, rtol=5e-2)

    print("KERNEL_OK")
</pallas_src>

<mosaic_0001>
module attributes {stable_mosaic.version = 11 : i64} {
  func.func @actor_kernel(%arg0: i32, %arg1: memref<8x8xf32, #tpu.memory_space<vmem>>, %arg2: memref<8x32xf32, #tpu.memory_space<vmem>>, %arg3: memref<1x32xf32, #tpu.memory_space<vmem>>, %arg4: memref<32x32xf32, #tpu.memory_space<vmem>>, %arg5: memref<1x32xf32, #tpu.memory_space<vmem>>, %arg6: memref<32x128xf32, #tpu.memory_space<vmem>>, %arg7: memref<1x128xf32, #tpu.memory_space<vmem>>, %arg8: memref<8x2xf32, #tpu.memory_space<vmem>>) attributes {dimension_semantics = [#tpu.dimension_semantics<parallel>], iteration_bounds = array<i64: 1>, scalar_prefetch = 0 : i64, scratch_operands = 0 : i64, tpu.core_type = #tpu.core_type<tc>, window_params = [{transform_indices = @transform_0, window_bounds = array<i64: 8, 8>}, {pipeline_mode = #tpu.pipeline_mode<synchronous>, transform_indices = @transform_1, window_bounds = array<i64: 8, 32>}, {pipeline_mode = #tpu.pipeline_mode<synchronous>, transform_indices = @transform_2, window_bounds = array<i64: 1, 32>}, {pipeline_mode = #tpu.pipeline_mode<synchronous>, transform_indices = @transform_3, window_bounds = array<i64: 32, 32>}, {pipeline_mode = #tpu.pipeline_mode<synchronous>, transform_indices = @transform_4, window_bounds = array<i64: 1, 32>}, {pipeline_mode = #tpu.pipeline_mode<synchronous>, transform_indices = @transform_5, window_bounds = array<i64: 32, 128>}, {pipeline_mode = #tpu.pipeline_mode<synchronous>, transform_indices = @transform_6, window_bounds = array<i64: 1, 128>}, {transform_indices = @transform_7, window_bounds = array<i64: 8, 2>}]} {
    %c0 = arith.constant 0 : index
    %c0_0 = arith.constant 0 : index
    %0 = vector.load %arg1[%c0, %c0_0] : memref<8x8xf32, #tpu.memory_space<vmem>>, vector<8x8xf32>
    %c0_1 = arith.constant 0 : index
    %c0_2 = arith.constant 0 : index
    %1 = vector.load %arg2[%c0_1, %c0_2] : memref<8x32xf32, #tpu.memory_space<vmem>>, vector<8x32xf32>
    %cst = arith.constant dense<0.000000e+00> : vector<8x32xf32>
    %2 = tpu.matmul %0, %1, %cst {dimension_numbers = #tpu.dot_dimension_numbers<[1], [0], [0], [1], [0, 0, 1, 1], [], []>} : vector<8x8xf32>, vector<8x32xf32>, vector<8x32xf32> -> vector<8x32xf32>
    %c0_3 = arith.constant 0 : index
    %c0_4 = arith.constant 0 : index
    %3 = vector.load %arg3[%c0_3, %c0_4] : memref<1x32xf32, #tpu.memory_space<vmem>>, vector<1x32xf32>
    %4 = vector.broadcast %3 : vector<1x32xf32> to vector<8x32xf32>
    %5 = arith.addf %2, %4 : vector<8x32xf32>
    %cst_5 = arith.constant 0.00999999977 : f32
    %6 = vector.broadcast %cst_5 : f32 to vector<8x32xf32>
    %7 = arith.mulf %6, %5 : vector<8x32xf32>
    %8 = arith.maximumf %5, %7 : vector<8x32xf32>
    %c0_6 = arith.constant 0 : index
    %c0_7 = arith.constant 0 : index
    %9 = vector.load %arg4[%c0_6, %c0_7] : memref<32x32xf32, #tpu.memory_space<vmem>>, vector<32x32xf32>
    %cst_8 = arith.constant dense<0.000000e+00> : vector<8x32xf32>
    %10 = tpu.matmul %8, %9, %cst_8 {dimension_numbers = #tpu.dot_dimension_numbers<[1], [0], [0], [1], [0, 0, 1, 1], [], []>} : vector<8x32xf32>, vector<32x32xf32>, vector<8x32xf32> -> vector<8x32xf32>
    %c0_9 = arith.constant 0 : index
    %c0_10 = arith.constant 0 : index
    %11 = vector.load %arg5[%c0_9, %c0_10] : memref<1x32xf32, #tpu.memory_space<vmem>>, vector<1x32xf32>
    %12 = vector.broadcast %11 : vector<1x32xf32> to vector<8x32xf32>
    %13 = arith.addf %10, %12 : vector<8x32xf32>
    %cst_11 = arith.constant 0.00999999977 : f32
    %14 = vector.broadcast %cst_11 : f32 to vector<8x32xf32>
    %15 = arith.mulf %14, %13 : vector<8x32xf32>
    %16 = arith.maximumf %13, %15 : vector<8x32xf32>
    %c0_12 = arith.constant 0 : index
    %c0_13 = arith.constant 0 : index
    %17 = vector.load %arg6[%c0_12, %c0_13] : memref<32x128xf32, #tpu.memory_space<vmem>>, vector<32x128xf32>
    %cst_14 = arith.constant dense<0.000000e+00> : vector<8x128xf32>
    %18 = tpu.matmul %16, %17, %cst_14 {dimension_numbers = #tpu.dot_dimension_numbers<[1], [0], [0], [1], [0, 0, 1, 1], [], []>} : vector<8x32xf32>, vector<32x128xf32>, vector<8x128xf32> -> vector<8x128xf32>
    %c0_15 = arith.constant 0 : index
    %c0_16 = arith.constant 0 : index
    %19 = vector.load %arg7[%c0_15, %c0_16] : memref<1x128xf32, #tpu.memory_space<vmem>>, vector<1x128xf32>
    %20 = vector.broadcast %19 : vector<1x128xf32> to vector<8x128xf32>
    %21 = arith.addf %18, %20 : vector<8x128xf32>
    %22 = arith.mulf %21, %21 : vector<8x128xf32>
    %cst_17 = arith.constant dense<0.000000e+00> : vector<8xf32>
    %23 = vector.multi_reduction <add>, %22, %cst_17 [1] : vector<8x128xf32> to vector<8xf32>
    %24 = vector.shape_cast %23 : vector<8xf32> to vector<8x1xf32>
    %cst_18 = arith.constant 1.000000e-30 : f32
    %25 = vector.broadcast %cst_18 : f32 to vector<8x1xf32>
    %26 = arith.maximumf %24, %25 : vector<8x1xf32>
    %27 = math.rsqrt %26 : vector<8x1xf32>
    %28 = arith.mulf %24, %27 : vector<8x1xf32>
    %29 = math.tanh %28 : vector<8x1xf32>
    %30 = arith.mulf %29, %27 : vector<8x1xf32>
    %31 = vector.extract_strided_slice %21 {offsets = [0, 0], sizes = [8, 2], strides = [1, 1]} : vector<8x128xf32> to vector<8x2xf32>
    %32 = math.absf %31 : vector<8x2xf32>
    %cst_19 = arith.constant 1.000000e+00 : f32
    %33 = vector.broadcast %cst_19 : f32 to vector<8x1xf32>
    %34 = arith.mulf %30, %33 : vector<8x1xf32>
    %35 = vector.broadcast %34 : vector<8x1xf32> to vector<8x2xf32>
    %36 = arith.mulf %32, %35 : vector<8x2xf32>
    %c0_20 = arith.constant 0 : index
    %c0_21 = arith.constant 0 : index
    %37 = vector.load %arg8[%c0_20, %c0_21] : memref<8x2xf32, #tpu.memory_space<vmem>>, vector<8x2xf32>
    tpu.vector_store %arg8[%c0_20, %c0_21], %36 {strides = array<i32>} : memref<8x2xf32, #tpu.memory_space<vmem>>, vector<8x2xf32>,
    return
  }
  func.func @transform_0(%arg0: i32) -> (i32, i32) {
    %c0_i32 = arith.constant 0 : i32
    %c0_i32_0 = arith.constant 0 : i32
    return %arg0, %c0_i32 : i32, i32
  }
  func.func @transform_1(%arg0: i32) -> (i32, i32) {
    %c0_i32 = arith.constant 0 : i32
    %c0_i32_0 = arith.constant 0 : i32
    %c0_i32_1 = arith.constant 0 : i32
    return %c0_i32, %c0_i32_0 : i32, i32
  }
  func.func @transform_2(%arg0: i32) -> (i32, i32) {
    %c0_i32 = arith.constant 0 : i32
    %c0_i32_0 = arith.constant 0 : i32
    %c0_i32_1 = arith.constant 0 : i32
    return %c0_i32, %c0_i32_0 : i32, i32
  }
  func.func @transform_3(%arg0: i32) -> (i32, i32) {
    %c0_i32 = arith.constant 0 : i32
    %c0_i32_0 = arith.constant 0 : i32
    %c0_i32_1 = arith.constant 0 : i32
    return %c0_i32, %c0_i32_0 : i32, i32
  }
  func.func @transform_4(%arg0: i32) -> (i32, i32) {
    %c0_i32 = arith.constant 0 : i32
    %c0_i32_0 = arith.constant 0 : i32
    %c0_i32_1 = arith.constant 0 : i32
    return %c0_i32, %c0_i32_0 : i32, i32
  }
  func.func @transform_5(%arg0: i32) -> (i32, i32) {
    %c0_i32 = arith.constant 0 : i32
    %c0_i32_0 = arith.constant 0 : i32
    %c0_i32_1 = arith.constant 0 : i32
    return %c0_i32, %c0_i32_0 : i32, i32
  }
  func.func @transform_6(%arg0: i32) -> (i32, i32) {
    %c0_i32 = arith.constant 0 : i32
    %c0_i32_0 = arith.constant 0 : i32
    %c0_i32_1 = arith.constant 0 : i32
    return %c0_i32, %c0_i32_0 : i32, i32
  }
  func.func @transform_7(%arg0: i32) -> (i32, i32) {
    %c0_i32 = arith.constant 0 : i32
    %c0_i32_0 = arith.constant 0 : i32
    return %arg0, %c0_i32 : i32, i32
  }
}

</mosaic_0001>

<bundles_post_ra>
// kernel: tpu_custom_call.1
= control target key start
LH: loop header
LB: loop body
LE: loop exit
PB: predicated region body
PF: predicated region fallthrough
CT: control target
= control target key end

     0   :  { %12 = vsyncpa [#allocation3], 0  ;;  %s695_s0 = inlined_call_operand.hbm [shape: f32[2,8], index: 0, kind: input, shape index: {}]   ;;  %s696_s1 = inlined_call_operand.hbm [shape: f32[8,32], index: 1, kind: input, shape index: {}]   ;;  %s697_s2 = inlined_call_operand.vmem [shape: f32[1,32], index: 2, kind: input, shape index: {}]   ;;  %s698_s3 = inlined_call_operand.hbm [shape: f32[32,32], index: 3, kind: input, shape index: {}]   ;;  %s699_s4 = inlined_call_operand.vmem [shape: f32[1,32], index: 4, kind: input, shape index: {}]   ;;  %s700_s5 = inlined_call_operand.hbm [shape: f32[32,128], index: 5, kind: input, shape index: {}]   ;;  %s701_s6 = inlined_call_operand.vmem [shape: f32[1,128], index: 6, kind: input, shape index: {}]   ;;  %s702_s7 = inlined_call_operand.hbm [shape: f32[2,2], index: 7, kind: output, shape index: {}]  }
   0x1   :  { %13 = vsyncpa [#allocation6], 0 }
   0x2   :  { %14 = vsyncpa [#allocation9], 0 }
   0x3   :  { %15 = vsyncpa [#allocation4], 0 }
   0x4   :  { %20 = vsyncadd [#allocation3], 96  ;;  %s558_s24 = smov [#allocation5]   ;;  %s559_s26 = smov [#allocation2]  }
   0x5   :  { %s34_s25 = sshll.u32 %s558_s24, 4  ;;  %s21_s27 = sshll.u32 %s559_s26, 4  ;;  %s35_s25 = int_to_ptr.vmem [resolvable:$true] %s34_s25  ;;  %s610_s27 = int_to_ptr.vmem [resolvable:$true] %s21_s27 }
   0x6   :  { %s440_s30 = scalar_lea.hbm %s696_s1, 128 }
   0x7   :  { %p441_p0 = scmp.ne.s32.totalorder %s696_s1, %s440_s30  ;;  %p444_p1 = scmp.lt.u32.totalorder %s440_s30, %s696_s1 }
   0x9   :  { %p446_p2 = pnand %p444_p1, %p441_p0 }
   0xb   :  { %449 = shalt.err (!%p446_p2)
}
   0xc   :  { %s450_s12 = scalar_lea.vmem %s35_s25, 128  ;;  %p455_p4 = scmp.lt.s32.totalorder %s35_s25, %s35_s25 }
   0xd   :  { %p451_p3 = scmp.ne.s32.totalorder %s35_s25, %s450_s12  ;;  %p456_p5 = scmp.lt.s32.totalorder %s450_s12, %s450_s12 }
   0xf   :  { %p457_p6 = por %p456_p5, %p455_p4 }
  0x11   :  { %p458_p7 = pnand %p457_p6, %p451_p3 }
  0x13   :  { %461 = shalt.err (!%p458_p7)
}
  0x14   :  { %37 = dma.hbm_to_vmem [thread:$0]  %s696_s1, 128, %s35_s25, [#allocation6]  }
  0x15   :  { %s462_s17 = scalar_lea.hbm %s695_s0, 32 }
  0x16   :  { %p463_p8 = scmp.ne.s32.totalorder %s695_s0, %s462_s17  ;;  %p466_p9 = scmp.lt.u32.totalorder %s462_s17, %s695_s0 }
  0x18   :  { %p468_p10 = pnand %p466_p9, %p463_p8 }
  0x1a   :  { %471 = shalt.err (!%p468_p10)
}
  0x1b   :  { %s472_s22 = scalar_lea.vmem %s610_s27, 32  ;;  %s476_s1 = scalar_lea.vmem %s610_s27, 128 }
  0x1c   :  { %p473_p11 = scmp.ne.s32.totalorder %s610_s27, %s472_s22  ;;  %p477_p12 = scmp.lt.s32.totalorder %s610_s27, %s610_s27 }
  0x1d   :  { %p478_p13 = scmp.lt.s32.totalorder %s476_s1, %s472_s22 }
  0x1f   :  { %p479_p0 = por %p478_p13, %p477_p12 }
  0x21   :  { %p480_p1 = pnand %p479_p0, %p473_p11 }
  0x23   :  { %483 = shalt.err (!%p480_p1)
}
  0x24   :  { %s560_s23 = smov 32   ;;  %s561_s24 = smov 2  }
  0x25   :  { %27 = dma.hbm_to_vmem [thread:$0]  %s695_s0, 32, %s610_s27, [#allocation3], %s560_s23, %s560_s23, %s561_s24  }
  0x26   :  { %s562_s28 = smov [#allocation7]   ;;  %s484_s9 = scalar_lea.hbm %s698_s3, 512 }
  0x27   :  { %s45_s29 = sshll.u32 %s562_s28, 4  ;;  %p485_p2 = scmp.ne.s32.totalorder %s698_s3, %s484_s9  ;;  %s46_s29 = int_to_ptr.vmem [resolvable:$true] %s45_s29 }
  0x28   :  { %p488_p3 = scmp.lt.u32.totalorder %s484_s9, %s698_s3 }
  0x2a   :  { %p490_p4 = pnand %p488_p3, %p485_p2 }
  0x2c   :  { %493 = shalt.err (!%p490_p4)
}
  0x2d   :  { %s494_s14 = scalar_lea.vmem %s46_s29, 512  ;;  %p499_p6 = scmp.lt.s32.totalorder %s46_s29, %s46_s29 }
  0x2e   :  { %p495_p5 = scmp.ne.s32.totalorder %s46_s29, %s494_s14  ;;  %p500_p7 = scmp.lt.s32.totalorder %s494_s14, %s494_s14 }
  0x30   :  { %p501_p8 = por %p500_p7, %p499_p6 }
  0x32   :  { %p502_p9 = pnand %p501_p8, %p495_p5 }
  0x34   :  { %505 = shalt.err (!%p502_p9)
}
  0x35   :  { %s563_s0 = smov 128   ;;  %s564_s27 = smov 8  }
  0x36   :  { %51 = dma.hbm_to_vmem [thread:$0]  %s698_s3, 512, %s46_s29, [#allocation6], %s563_s0, %s563_s0, %s564_s27  }
  0x37   :  { %s565_s17 = smov [#allocation8]   ;;  %s506_s21 = scalar_lea.hbm %s700_s5, 512 }
  0x38   :  { %s59_s18 = sshll.u32 %s565_s17, 4  ;;  %p507_p10 = scmp.ne.s32.totalorder %s700_s5, %s506_s21  ;;  %s60_s18 = int_to_ptr.vmem [resolvable:$true] %s59_s18 }
  0x39   :  { %p510_p11 = scmp.lt.u32.totalorder %s506_s21, %s700_s5 }
  0x3b   :  { %p512_p12 = pnand %p510_p11, %p507_p10 }
  0x3d   :  { %515 = shalt.err (!%p512_p12)
}
  0x3e   :  { %s516_s28 = scalar_lea.vmem %s60_s18, 512  ;;  %p521_p0 = scmp.lt.s32.totalorder %s60_s18, %s60_s18 }
  0x3f   :  { %p517_p13 = scmp.ne.s32.totalorder %s60_s18, %s516_s28  ;;  %p522_p1 = scmp.lt.s32.totalorder %s516_s28, %s516_s28 }
  0x41   :  { %p523_p2 = por %p522_p1, %p521_p0 }
  0x43   :  { %p524_p3 = pnand %p523_p2, %p517_p13 }
  0x45   :  { %527 = shalt.err (!%p524_p3)
}
  0x46   :  { %65 = dma.hbm_to_vmem [thread:$0]  %s700_s5, 512, %s60_s18, [#allocation9], %s563_s0, %s563_s0, %s564_s27  }
  0x47   :  { %550 = dma.done.wait [#allocation3], 128  }
  0x48   :  { %551 = vsyncadd [#allocation3], 4294967168 }
  0x49   :  { %552 = dma.done.wait [#allocation6], 640  }
  0x4a   :  { %553 = vsyncadd [#allocation6], 4294966656 }
  0x4b   :  { %554 = dma.done.wait [#allocation9], 512  }
  0x4c   :  { %555 = vsyncadd [#allocation9], 4294966784  ;;  %v566_v0 = vmov 0.0   ;;  %vm567_vm0 = vmmov 0   ;;  %v568_v1 = vmov 0.0|0.0   ;;  %vm89_vm1 = vcmask 64512  }
  0x4d   :  { %385 = vmatprep.subr.mxu0 %v566_v0  ;;  %387 = vmatprep.mubr.msk.f32.mxu0 %vm567_vm0, %v566_v0  ;;  %v81_v2 = vld [vmem:[#allocation5] sm:$0xff]  ;;  %v80_v3 = vld [vmem:[#allocation2] sm:$0xff]  ;;  %v165_v4 = vld [vmem:[#allocation7] sm:$0xff]  ;;  %vm176_vm2 = vcmask 261120   ;;  %vm346_vm3 = vcmask 15360  }
  0x4e   :  { %412 = vmatprep.subr.bf16.mxu1 %v568_v1  ;;  %398 = vmatprep.mubr.msk.f32.mxu1 %vm567_vm0, %v566_v0  ;;  %v166_v5 = vld [vmem:[#allocation7 + $0x8] sm:$0xff]  ;;  %v167_v7 = vld [vmem:[#allocation7 + $0x10] sm:$0xff]  ;;  %v168_v8 = vld [vmem:[#allocation7 + $0x18] sm:$0xff] }
  0x4f   :  { %386 = vmatpush3.msra.mxu0 %v81_v2  ;;  %v413_v6 = vpack.c.bf16 %v166_v5, %v165_v4  ;;  %v416_v9 = vpack.c.bf16 %v168_v8, %v167_v7  ;;  %v367_v10 = vld [vmem:[%s697_s2] ss:$0 sm:$0xff]  ;;  %v252_v16 = vld [vmem:[#allocation8] sm:$0xff]  ;;  %v253_v17 = vld [vmem:[#allocation8 + $0x8] sm:$0xff] }
  0x50   :  { %388 = vmatmul.mubr.msk.f32.vlgmr.msra.gmra.mrb[0].mxu0 %vm89_vm1, %v80_v3  ;;  %418 = vmatprep.subr.bf16.mxu0 %v568_v1  ;;  %v419_v18 = vpack.c.bf16 %v253_v17, %v252_v16  ;;  %v254_v19 = vld [vmem:[#allocation8 + $0x10] sm:$0xff]  ;;  %v255_v20 = vld [vmem:[#allocation8 + $0x18] sm:$0xff] }
  0x51   :  { %409 = vmatprep.mubr.msk.f32.mxu0 %vm567_vm0, %v566_v0  ;;  %414 = vmatpush3.bf16.msra.mxu1 %v413_v6  ;;  %v422_v21 = vpack.c.bf16 %v255_v20, %v254_v19  ;;  %v369_v22 = vld [vmem:[%s699_s4] ss:$0 sm:$0xff] }
  0x52   :  { %415 = vmatprep.subr.bf16.mxu1 %v568_v1  ;;  %420 = vmatpush3.bf16.msra.mxu0 %v419_v18  ;;  %v371_v28 = vld [vmem:[%s701_s6] ss:$0 sm:$0xff] }
  0x53   :  { %421 = vmatprep.subr.bf16.mxu0 %v568_v1 }
  0x55   :  { %417 = vmatpush3.bf16.msra.mxu1 %v416_v9 }
  0x56   :  { %423 = vmatpush3.bf16.msra.mxu0 %v422_v21 }
 0x123   :  { %v159_v11 = vpop.f32.mrb[0].mxu0 }
 0x124   :  { %v160_v12 = vadd.f32 %v367_v10, %v159_v11  ;;  %v389_v13 = vpop.f32.mrb[1].mxu0 }
 0x126   :  { %v163_v14 = vmul.f32 0.01, %v160_v12 }
 0x128   :  { %v164_v15 = vmax.f32 %v160_v12, %v163_v14 }
 0x12a   :  { %399 = vmatmul.mubr.msk.f32.vlgmr.msra.gmra.mrb[0].mxu1 %vm176_vm2, %v164_v15 }
 0x1fd   :  { %v246_v23 = vpop.f32.mrb[0].mxu1 }
 0x1fe   :  { %v247_v24 = vadd.f32 %v369_v22, %v246_v23  ;;  %v400_v25 = vpop.f32.mrb[1].mxu1 }
 0x200   :  { %v250_v26 = vmul.f32 0.01, %v247_v24 }
 0x202   :  { %v251_v27 = vmax.f32 %v247_v24, %v250_v26 }
 0x204   :  { %410 = vmatmul.mubr.msk.f32.vlgmr.msra.gmra.mrb[2].mxu0 %vm176_vm2, %v251_v27 }
 0x2d7   :  { %v332_v29 = vpop.f32.mrb[2].mxu0 }
 0x2d8   :  { %v333_v30 = vadd.f32 %v371_v28, %v332_v29  ;;  %v411_v31 = vpop.f32.mrb[3].mxu0 }
 0x2da   :  { %v336_v32 = vmul.f32 %v333_v30, %v333_v30  ;;  %v344_v38 = vand.u32 2147483647, %v333_v30 }
 0x2dc   :  { %337 = vadd.xlane.f32.xlu0 %v336_v32 }
 0x369   :  { %v338_v33 = vpop.xlane.xlu0 %337 }
 0x36a   :  { %v339_v34 = vmax.f32 %v338_v33, 1e-30 }
 0x36c   :  { %436 = vrsqrt.f32 %v339_v34 }
 0x376   :  { %v437_v35 = vpop.eup %436 }
 0x377   :  { %v341_v36 = vmul.f32 %v437_v35, %v338_v33 }
 0x379   :  { %438 = vtanh.f32 %v341_v36 }
 0x383   :  { %v439_v37 = vpop.eup %438 }
 0x384   :  { %v343_v39 = vmul.f32 %v439_v37, %v437_v35 }
 0x386   :  { %v345_v40 = vmul.f32 %v344_v38, %v343_v39 }
 0x388   :  { %347 = vst.msk [vmem:[#allocation10] sm:$0xff] %vm346_vm3, %v345_v40 }
 0x389   :  { %352 = vsyncadd [#allocation4], 96  ;;  %s569_s4 = smov [#allocation10]  }
 0x38a   :  { %s353_s6 = sshll.u32 %s569_s4, 4  ;;  %s354_s6 = int_to_ptr.vmem [resolvable:$true] %s353_s6 }
 0x38b   :  { %s528_s11 = scalar_lea.vmem %s354_s6, 32  ;;  %s532_s12 = scalar_lea.vmem %s354_s6, 128 }
 0x38c   :  { %p529_p4 = scmp.ne.s32.totalorder %s354_s6, %s528_s11  ;;  %p533_p5 = scmp.lt.s32.totalorder %s354_s6, %s354_s6 }
 0x38d   :  { %p534_p6 = scmp.lt.s32.totalorder %s532_s12, %s528_s11 }
 0x38f   :  { %p535_p7 = por %p534_p6, %p533_p5 }
 0x391   :  { %p536_p8 = pnand %p535_p7, %p529_p4 }
 0x393   :  { %539 = shalt.err (!%p536_p8)
}
 0x394   :  { %s540_s0 = scalar_lea.hbm %s702_s7, 32 }
 0x395   :  { %p541_p9 = scmp.ne.s32.totalorder %s702_s7, %s540_s0  ;;  %p544_p10 = scmp.lt.u32.totalorder %s540_s0, %s702_s7 }
 0x397   :  { %p546_p11 = pnand %p544_p10, %p541_p9 }
 0x399   :  { %549 = shalt.err (!%p546_p11)
}
 0x39a   :  { %359 = dma.vmem_to_hbm [thread:$0]  %s354_s6, 32, %s702_s7, [#allocation4], %s560_s23, %s560_s23, %s561_s24  }
 0x39b   :  { %556 = dma.done.wait [#allocation4], 128  }
 0x39c   :  { %557 = vsyncadd [#allocation4], 4294967168 }
 0x39d   :  { %363 = vsyncpa [#allocation3], 1 }
 0x39e   :  { %364 = vsyncpa [#allocation6], 1 }
 0x39f   :  { %365 = vsyncpa [#allocation9], 1 }
 0x3a0   :  { %366 = vsyncpa [#allocation4], 1 }

</bundles_post_ra>
